<compile_context>
chip_gen: v6e
topology: v6e:2x2x1
jax: 0.10.0
libtpu: 0.0.40
codegen_flags: <defaults>
</compile_context>

<pallas_src>
import functools

import jax
import jax.numpy as jnp
from jax.experimental import pallas as pl
from jax.experimental.pallas import tpu as pltpu

LN_EPS = 1e-5  # torch.nn.LayerNorm default


def _round_up(x, m):
    return (x + m - 1) // m * m


def _linear_layer_kernel(x_ref, w_ref, b_ref, o_ref):
    # x_ref: (tm, Din)   row tile of the input
    # w_ref: (Din, tn)   folded, pre-transposed weight tile
    # b_ref: (1, tn)     folded bias tile
    # o_ref: (tm, tn)
    x = x_ref[...].astype(jnp.float32)

    # LayerNorm statistics in f32 (biased variance, like torch). gamma/beta are
    # already folded into w_ref / b_ref, so only normalization remains here.
    mean = jnp.mean(x, axis=-1, keepdims=True)
    centered = x - mean
    var = jnp.mean(centered * centered, axis=-1, keepdims=True)
    xn = centered * jax.lax.rsqrt(var + LN_EPS)

    # Dropout(p=0.1) is identity at inference time.
    # Keep MXU operands in the weight dtype (bf16 stays bf16); accumulate f32.
    xn = xn.astype(w_ref.dtype)
    y = jnp.dot(xn, w_ref[...], preferred_element_type=jnp.float32)
    y = y + b_ref[...].astype(jnp.float32)
    o_ref[...] = jnp.maximum(y, 0.0).astype(o_ref.dtype)


def fold_layernorm_into_linear(ln_gamma, ln_beta, weight, bias):
    """One-time parameter prep (hoist out of the per-step forward path).

    weight: (Dout, Din) torch convention; bias: (Dout,).
    Returns w_prep (Din, Dout) in the weight dtype and b_prep (Dout,) float32.
    """
    g = ln_gamma.astype(jnp.float32)
    be = ln_beta.astype(jnp.float32)
    w32 = weight.astype(jnp.float32)
    w_prep = (w32 * g[None, :]).T                 # (Din, Dout), MXU-ready layout
    b_prep = bias.astype(jnp.float32) + be @ w32.T
    return w_prep.astype(weight.dtype), b_prep


def _vmem_budget_bytes(tm, din, tn, x_itemsize, w_itemsize, out_itemsize):
    x_tile = tm * din * x_itemsize
    w_tile = din * tn * w_itemsize
    o_tile = tm * tn * out_itemsize
    b_tile = tn * 4
    pipelined = 2 * (x_tile + w_tile + o_tile + b_tile)   # double buffering
    working = (tm * din + tm * tn) * 4                    # f32 intermediates
    return pipelined + working + (4 << 20)                # headroom


@functools.partial(jax.jit, static_argnames=("tm", "tn"))
def linear_layer_forward(x, w_prep, b_prep, *, tm=256, tn=256):
    """x: (N, L, Din); w_prep: (Din, Dout); b_prep: (Dout,) — see fold_* above."""
    N, L, Din = x.shape
    Din_w, Dout = w_prep.shape
    assert Din == Din_w
    rows = N * L

    # Row tile: multiple of 16 for sub-32-bit inputs (sublane packing), 8 for
    # f32; clamped so tiny problems are not padded to a full 256-row tile.
    row_align = 16 if jnp.dtype(x.dtype).itemsize < 4 else 8
    tm_eff = _round_up(min(tm, _round_up(rows, row_align)), row_align)
    rows_p = _round_up(rows, tm_eff)

    # Output lane tile: multiple of 128 so stores are unmasked / lane-dense.
    tn_eff = _round_up(min(tn, _round_up(Dout, 128)), 128)
    dout_p = _round_up(Dout, tn_eff)

    x2d = x.reshape(rows, Din)
    if rows_p != rows:
        x2d = jnp.pad(x2d, ((0, rows_p - rows), (0, 0)))

    w = w_prep
    b2d = b_prep.reshape(1, Dout)
    if dout_p != Dout:                      # no-op when Dout is 128-aligned
        w = jnp.pad(w, ((0, 0), (0, dout_p - Dout)))
        b2d = jnp.pad(b2d, ((0, 0), (0, dout_p - Dout)))

    grid = (rows_p // tm_eff, dout_p // tn_eff)
    vmem_bytes = max(
        32 << 20,
        _vmem_budget_bytes(tm_eff, Din, tn_eff,
                           jnp.dtype(x.dtype).itemsize,
                           jnp.dtype(w.dtype).itemsize,
                           jnp.dtype(x.dtype).itemsize))

    out2d = pl.pallas_call(
        _linear_layer_kernel,
        out_shape=jax.ShapeDtypeStruct((rows_p, dout_p), x.dtype),
        grid_spec=pltpu.PrefetchScalarGridSpec(
            num_scalar_prefetch=0,
            grid=grid,
            in_specs=[
                pl.BlockSpec((tm_eff, Din), lambda i, j: (i, 0)),
                pl.BlockSpec((Din, tn_eff), lambda i, j: (0, j)),
                pl.BlockSpec((1, tn_eff), lambda i, j: (0, j)),
            ],
            out_specs=pl.BlockSpec((tm_eff, tn_eff), lambda i, j: (i, j)),
        ),
        compiler_params=pltpu.CompilerParams(
            dimension_semantics=("parallel", "parallel"),
            vmem_limit_bytes=int(vmem_bytes)),
    )(x2d, w, b2d)

    return out2d[:rows, :Dout].reshape(N, L, Dout)


def _reference(x, ln_gamma, ln_beta, weight, bias):
    xf = x.astype(jnp.float32)
    mean = jnp.mean(xf, axis=-1, keepdims=True)
    var = jnp.mean((xf - mean) ** 2, axis=-1, keepdims=True)
    xn = (xf - mean) / jnp.sqrt(var + LN_EPS) * ln_gamma + ln_beta
    y = xn @ weight.T.astype(jnp.float32) + bias
    return jnp.maximum(y, 0.0).astype(x.dtype)


if __name__ == "__main__":
    key = jax.random.PRNGKey(0)

    # Primary small test plus one case exercising the row / out-feature padding.
    cases = [
        (2, 8, 32, 32),    # (N, L, in_hsz, out_hsz)
        (2, 13, 32, 48),   # non-aligned rows and out features -> padded tiles
    ]
    for idx, (N, L, Din, Dout) in enumerate(cases):
        kx, kw, kb, kg, kbe, key = jax.random.split(key, 6)
        x = jax.random.normal(kx, (N, L, Din), dtype=jnp.float32)

        # Deterministic synthetic parameters (not a checkpoint load).
        ln_gamma = 1.0 + 0.1 * jax.random.normal(kg, (Din,), dtype=jnp.float32)
        ln_beta = 0.1 * jax.random.normal(kbe, (Din,), dtype=jnp.float32)
        bound = 1.0 / float(Din) ** 0.5
        weight = jax.random.uniform(kw, (Dout, Din), minval=-bound,
                                    maxval=bound, dtype=jnp.float32)
        bias = jax.random.uniform(kb, (Dout,), minval=-bound, maxval=bound,
                                  dtype=jnp.float32)

        # One-time param prep (would be hoisted/cached in a real model).
        w_prep, b_prep = fold_layernorm_into_linear(ln_gamma, ln_beta,
                                                    weight, bias)

        out = linear_layer_forward(x, w_prep, b_prep)
        out = jax.block_until_ready(out)

        ref = _reference(x, ln_gamma, ln_beta, weight, bias)
        assert out.shape == (N, L, Dout)
        assert jnp.allclose(out, ref, atol=1e-4, rtol=1e-4), (
            f"mismatch in case {idx}: max abs err "
            f"{float(jnp.max(jnp.abs(out - ref)))}")

    print("KERNEL_OK")
</pallas_src>

<mosaic_0001>
module attributes {stable_mosaic.version = 11 : i64} {
  func.func @_linear_layer_kernel(%arg0: i32, %arg1: i32, %arg2: memref<16x32xf32, #tpu.memory_space<vmem>>, %arg3: memref<32x128xf32, #tpu.memory_space<vmem>>, %arg4: memref<1x128xf32, #tpu.memory_space<vmem>>, %arg5: memref<16x128xf32, #tpu.memory_space<vmem>>) attributes {dimension_semantics = [#tpu.dimension_semantics<parallel>, #tpu.dimension_semantics<parallel>], iteration_bounds = array<i64: 1, 1>, scalar_prefetch = 0 : i64, scratch_operands = 0 : i64, tpu.core_type = #tpu.core_type<tc>, window_params = [{transform_indices = @transform_0, window_bounds = array<i64: 16, 32>}, {transform_indices = @transform_1, window_bounds = array<i64: 32, 128>}, {transform_indices = @transform_2, window_bounds = array<i64: 1, 128>}, {transform_indices = @transform_3, window_bounds = array<i64: 16, 128>}]} {
    %c0 = arith.constant 0 : index
    %c0_0 = arith.constant 0 : index
    %0 = vector.load %arg2[%c0, %c0_0] : memref<16x32xf32, #tpu.memory_space<vmem>>, vector<16x32xf32>
    %cst = arith.constant dense<0.000000e+00> : vector<16xf32>
    %1 = vector.multi_reduction <add>, %0, %cst [1] : vector<16x32xf32> to vector<16xf32>
    %2 = vector.shape_cast %1 : vector<16xf32> to vector<16x1xf32>
    %cst_1 = arith.constant 3.200000e+01 : f32
    %3 = vector.broadcast %cst_1 : f32 to vector<16x1xf32>
    %4 = arith.divf %2, %3 : vector<16x1xf32>
    %5 = vector.broadcast %4 : vector<16x1xf32> to vector<16x32xf32>
    %6 = arith.subf %0, %5 : vector<16x32xf32>
    %7 = arith.mulf %6, %6 : vector<16x32xf32>
    %cst_2 = arith.constant dense<0.000000e+00> : vector<16xf32>
    %8 = vector.multi_reduction <add>, %7, %cst_2 [1] : vector<16x32xf32> to vector<16xf32>
    %9 = vector.shape_cast %8 : vector<16xf32> to vector<16x1xf32>
    %cst_3 = arith.constant 3.200000e+01 : f32
    %10 = vector.broadcast %cst_3 : f32 to vector<16x1xf32>
    %11 = arith.divf %9, %10 : vector<16x1xf32>
    %cst_4 = arith.constant 9.99999974E-6 : f32
    %12 = vector.broadcast %cst_4 : f32 to vector<16x1xf32>
    %13 = arith.addf %11, %12 : vector<16x1xf32>
    %14 = math.rsqrt %13 : vector<16x1xf32>
    %15 = vector.broadcast %14 : vector<16x1xf32> to vector<16x32xf32>
    %16 = arith.mulf %6, %15 : vector<16x32xf32>
    %c0_5 = arith.constant 0 : index
    %c0_6 = arith.constant 0 : index
    %17 = vector.load %arg3[%c0_5, %c0_6] : memref<32x128xf32, #tpu.memory_space<vmem>>, vector<32x128xf32>
    %cst_7 = arith.constant dense<0.000000e+00> : vector<16x128xf32>
    %18 = tpu.matmul %16, %17, %cst_7 {dimension_numbers = #tpu.dot_dimension_numbers<[1], [0], [0], [1], [0, 0, 1, 1], [], []>} : vector<16x32xf32>, vector<32x128xf32>, vector<16x128xf32> -> vector<16x128xf32>
    %c0_8 = arith.constant 0 : index
    %c0_9 = arith.constant 0 : index
    %19 = vector.load %arg4[%c0_8, %c0_9] : memref<1x128xf32, #tpu.memory_space<vmem>>, vector<1x128xf32>
    %20 = vector.broadcast %19 : vector<1x128xf32> to vector<16x128xf32>
    %21 = arith.addf %18, %20 : vector<16x128xf32>
    %cst_10 = arith.constant 0.000000e+00 : f32
    %22 = vector.broadcast %cst_10 : f32 to vector<16x128xf32>
    %23 = arith.maximumf %21, %22 : vector<16x128xf32>
    %c0_11 = arith.constant 0 : index
    %c0_12 = arith.constant 0 : index
    %24 = vector.load %arg5[%c0_11, %c0_12] : memref<16x128xf32, #tpu.memory_space<vmem>>, vector<16x128xf32>
    tpu.vector_store %arg5[%c0_11, %c0_12], %23 {strides = array<i32>} : memref<16x128xf32, #tpu.memory_space<vmem>>, vector<16x128xf32>,
    return
  }
  func.func @transform_0(%arg0: i32, %arg1: i32) -> (i32, i32) {
    %c0_i32 = arith.constant 0 : i32
    %c0_i32_0 = arith.constant 0 : i32
    return %arg0, %c0_i32 : i32, i32
  }
  func.func @transform_1(%arg0: i32, %arg1: i32) -> (i32, i32) {
    %c0_i32 = arith.constant 0 : i32
    %c0_i32_0 = arith.constant 0 : i32
    return %c0_i32, %arg1 : i32, i32
  }
  func.func @transform_2(%arg0: i32, %arg1: i32) -> (i32, i32) {
    %c0_i32 = arith.constant 0 : i32
    %c0_i32_0 = arith.constant 0 : i32
    return %c0_i32, %arg1 : i32, i32
  }
  func.func @transform_3(%arg0: i32, %arg1: i32) -> (i32, i32) {
    %c0_i32 = arith.constant 0 : i32
    return %arg0, %arg1 : i32, i32
  }
}

</mosaic_0001>

<bundles_post_ra>
// kernel: linear_layer_forward.1
= control target key start
LH: loop header
LB: loop body
LE: loop exit
PB: predicated region body
PF: predicated region fallthrough
CT: control target
= control target key end

     0   :  { %vm16_vm0 = vcmask 261120   ;;  %s221_s0 = inlined_call_operand.vmem [shape: f32[16,32], index: 0, kind: input, shape index: {}]   ;;  %s222_s1 = inlined_call_operand.vmem [shape: f32[32,128], index: 1, kind: input, shape index: {}]   ;;  %s223_s2 = inlined_call_operand.vmem [shape: f32[1,128], index: 2, kind: input, shape index: {}]   ;;  %s224_s3 = inlined_call_operand.vmem [shape: f32[16,128], index: 3, kind: output, shape index: {}]  }
   0x1   :  { %v14_v0 = vld [vmem:[%s221_s0] sm:$0xff]  ;;  %v15_v1 = vld [vmem:[%s221_s0 + $0x8] sm:$0xff]  ;;  %v47_v14 = vld [vmem:[%s222_s1 + $0x18] sm:$0xff] }
   0x2   :  { %v17_v2 = vsel %vm16_vm0, %v14_v0, 0.0  ;;  %v20_v3 = vsel %vm16_vm0, %v15_v1, 0.0  ;;  %v46_v15 = vld [vmem:[%s222_s1 + $0x10] sm:$0xff]  ;;  %153 = vmatprep.subr.mxu0 %v47_v14  ;;  %v45_v16 = vld [vmem:[%s222_s1 + $0x8] sm:$0xff]  ;;  %v44_v17 = vld [vmem:[%s222_s1] sm:$0xff] }
   0x3   :  { %18 = vadd.xlane.f32.xlu0 %v17_v2  ;;  %154 = vmatpush3.msra.mxu0 %v47_v14  ;;  %v144_v28 = vld [vmem:[%s223_s2] ss:$0 sm:$0xff] }
   0x4   :  { %155 = vmatprep.subr.mxu0 %v46_v15 }
   0x5   :  { %156 = vmatpush3.msra.mxu0 %v46_v15 }
   0x6   :  { %157 = vmatprep.subr.mxu0 %v45_v16 }
   0x7   :  { %21 = vadd.xlane.f32.xlu0 %v20_v3  ;;  %158 = vmatpush3.msra.mxu0 %v45_v16 }
   0x8   :  { %159 = vmatprep.subr.mxu0 %v44_v17 }
   0x9   :  { %160 = vmatpush3.msra.mxu0 %v44_v17 }
  0x8c   :  { %v19_v4 = vpop.xlane.xlu0 %18 }
  0x8d   :  { %v24_v5 = vmul.f32 0.03125, %v19_v4 }
  0x8f   :  { %v26_v6 = vsub.f32 %v14_v0, %v24_v5 }
  0x90   :  { %v22_v7 = vpop.xlane.xlu0 %21 }
  0x91   :  { %v25_v8 = vmul.f32 0.03125, %v22_v7  ;;  %v28_v9 = vmul.f32 %v26_v6, %v26_v6 }
  0x93   :  { %v27_v10 = vsub.f32 %v15_v1, %v25_v8  ;;  %v30_v11 = vsel %vm16_vm0, %v28_v9, 0.0 }
  0x94   :  { %31 = vadd.xlane.f32.xlu1 %v30_v11 }
  0x95   :  { %v29_v12 = vmul.f32 %v27_v10, %v27_v10 }
  0x97   :  { %v33_v13 = vsel %vm16_vm0, %v29_v12, 0.0 }
  0x98   :  { %34 = vadd.xlane.f32.xlu1 %v33_v13 }
 0x11d   :  { %v32_v18 = vpop.xlane.xlu1 %31 }
 0x11e   :  { %v36_v19 = vmul.f32 0.03125, %v32_v18 }
 0x120   :  { %v38_v20 = vadd.f32 1e-05, %v36_v19 }
 0x121   :  { %v35_v21 = vpop.xlane.xlu1 %34 }
 0x122   :  { %164 = vrsqrt.f32 %v38_v20  ;;  %v37_v22 = vmul.f32 0.03125, %v35_v21 }
 0x124   :  { %v39_v23 = vadd.f32 1e-05, %v37_v22 }
 0x126   :  { %166 = vrsqrt.f32 %v39_v23 }
 0x12f   :  { %v165_v24 = vpop.eup %164 }
 0x130   :  { %v42_v25 = vmul.f32 %v165_v24, %v26_v6 }
 0x132   :  { %161 = vmatprep.mubr.msk.f32.mxu0 %vm16_vm0, %v42_v25 }
 0x133   :  { %v167_v26 = vpop.eup %166 }
 0x134   :  { %v43_v27 = vmul.f32 %v167_v26, %v27_v10 }
 0x136   :  { %162 = vmatmul.mubr.msk.f32.vlgmr.msra.gmra.mxu0 %vm16_vm0, %v43_v27 }
 0x1f6   :  { %v163_v29 = vpop.f32.mrf.mxu0 }
 0x1f7   :  { %v133_v30 = vadd.f32 %v163_v29, %v144_v28 }
 0x1f8   :  { %v127_v31 = vpop.f32.mrf.mxu0 }
 0x1f9   :  { %v137_v32 = vmax.f32 %v133_v30, 0.0  ;;  %v128_v33 = vadd.f32 %v144_v28, %v127_v31 }
 0x1fb   :  { %139 = vst [vmem:[%s224_s3 + $0x8] sm:$0xff] %v137_v32  ;;  %v136_v34 = vmax.f32 %v128_v33, 0.0 }
 0x1fd   :  { %138 = vst [vmem:[%s224_s3] sm:$0xff] %v136_v34 }

</bundles_post_ra>
